<compile_context>
chip_gen: v5e
topology: v5e:2x2
jax: 0.10.0
libtpu: 0.0.40
codegen_flags: <defaults>
</compile_context>

<pallas_src>
import functools

import jax
import jax.numpy as jnp
from jax import lax
from jax.experimental import pallas as pl
from jax.experimental.pallas import tpu as pltpu

ALPHA = 1.0
GAMMA = 2.0  # gamma == 2 -> explicit square in the kernel (no pow)


def _round_up(x, m):
    return (x + m - 1) // m * m


def focal_loss_kernel(logits_ref, targets_ref, out_ref, *, n_rows, tm):
    i = pl.program_id(0)

    # out_ref is a single (1, 1) block whose index_map is constant across the
    # grid, so it stays resident in VMEM and acts as the accumulator (P3).
    @pl.when(i == 0)
    def _():
        out_ref[...] = jnp.zeros_like(out_ref)

    x = logits_ref[...].astype(jnp.float32)            # (TM, C)
    t = targets_ref[...]                               # (TM, 1) int32

    # numerically-stable softmax statistics along the class (lane) axis
    m = jnp.max(x, axis=-1, keepdims=True)             # (TM, 1)

    # fused target gather from x (single consumer for x - m below):
    # x_t[row] = x[row, t[row]]  via a (1, C) iota broadcast over sublanes
    col = lax.broadcasted_iota(jnp.int32, (1, x.shape[1]), 1)           # (1, C)
    x_t = jnp.sum(jnp.where(col == t, x, 0.0), axis=-1, keepdims=True)  # (TM, 1)
    z_t = x_t - m                                       # (TM, 1)

    ez = jnp.exp(x - m)                                 # single full-tile EUP pass
    sumexp = jnp.sum(ez, axis=-1, keepdims=True)        # (TM, 1)

    bce = jnp.log(sumexp) - z_t                         # -log p_target
    pt = jnp.exp(-bce)                                  # p_target (per-row exp, no divide)

    one_m_pt = 1.0 - pt
    f = ALPHA * one_m_pt * one_m_pt * bce               # gamma == 2 -> square, not pow

    # mask rows of the (possibly partial) last tile so padding never enters the sum
    rid = lax.broadcasted_iota(jnp.int32, (tm, 1), 0) + i * tm
    f = jnp.where(rid < n_rows, f, 0.0)

    # per-tile partial sum accumulated into the resident scalar output
    out_ref[...] += jnp.sum(f, axis=0, keepdims=True)   # (1, 1)


def _choose_tm(n, c, tm, block_bytes):
    """Pick TM so one f32 logits block is ~block_bytes (or the whole array)."""
    if tm is None:
        tm = max(8, (block_bytes // max(c * 4, 1)) // 8 * 8)
    if tm >= n:
        return n                       # single full block (always legal)
    return max(8, (tm // 8) * 8)       # multiple of 8 for the sublane constraint


def focal_loss(logits, targets, *, tm=None, block_bytes=4 * 1024 * 1024):
    """logits: (N, C) float (f32 or bf16); targets: (N,) integer class ids."""
    n, c = logits.shape

    tm = _choose_tm(n, c, tm, block_bytes)
    grid = (pl.cdiv(n, tm),)

    targets2d = targets.astype(jnp.int32).reshape(n, 1)

    total = pl.pallas_call(
        functools.partial(focal_loss_kernel, n_rows=n, tm=tm),
        out_shape=jax.ShapeDtypeStruct((1, 1), jnp.float32),
        grid=grid,
        in_specs=[
            pl.BlockSpec((tm, c), lambda i: (i, 0)),    # logits tile (streamed)
            pl.BlockSpec((tm, 1), lambda i: (i, 0)),    # target ids tile
        ],
        # constant block index -> output stays resident in VMEM as accumulator
        out_specs=pl.BlockSpec((1, 1), lambda i: (0, 0)),
        compiler_params=pltpu.CompilerParams(
            # the grid axis carries the resident accumulator -> must be "arbitrary"
            dimension_semantics=("arbitrary",),
            # 2 x ~4 MiB double-buffered logits + f32 intermediates << 40 MiB;
            # above v5e's 16 MiB scoped default, below v7x's 64 MiB physical.
            vmem_limit_bytes=40 * 1024 * 1024,
        ),
    )(logits, targets2d)

    # finalize: divide by the true N (padding rows were masked in-kernel)
    return total[0, 0] / jnp.float32(n)


def focal_loss_ref(logits, targets):
    # pure-JAX reference (same math as the PyTorch module)
    logp = jax.nn.log_softmax(logits.astype(jnp.float32), axis=-1)
    bce = -jnp.take_along_axis(logp, targets[:, None].astype(jnp.int32), axis=-1)[:, 0]
    pt = jnp.exp(-bce)
    return jnp.mean(ALPHA * (1.0 - pt) ** GAMMA * bce)


if __name__ == "__main__":
    key = jax.random.PRNGKey(0)
    k1, k2, k3, k4 = jax.random.split(key, 4)

    # small aligned case (single tile, byte-sized TM clamps to N)
    N, C = 8, 16
    logits = jax.random.normal(k1, (N, C), dtype=jnp.float32)
    targets = jax.random.randint(k2, (N,), 0, C, dtype=jnp.int32)
    loss = focal_loss(logits, targets)
    jax.block_until_ready(loss)
    ref = focal_loss_ref(logits, targets)
    assert jnp.allclose(loss, ref, rtol=1e-5, atol=1e-6), (loss, ref)

    # unaligned case exercising multiple tiles, partial-tile row masking and
    # the in-kernel accumulator across grid steps
    N2, C2 = 100, 130
    logits2 = jax.random.normal(k3, (N2, C2), dtype=jnp.float32)
    targets2 = jax.random.randint(k4, (N2,), 0, C2, dtype=jnp.int32)
    loss2 = focal_loss(logits2, targets2, tm=32)
    jax.block_until_ready(loss2)
    ref2 = focal_loss_ref(logits2, targets2)
    assert jnp.allclose(loss2, ref2, rtol=1e-5, atol=1e-6), (loss2, ref2)

    print("KERNEL_OK")
</pallas_src>

<mosaic_0001>
module attributes {stable_mosaic.version = 11 : i64} {
  func.func @focal_loss_kernel(%arg0: i32, %arg1: memref<8x16xf32, #tpu.memory_space<vmem>>, %arg2: memref<8x1xi32, #tpu.memory_space<vmem>>, %arg3: memref<1x1xf32, #tpu.memory_space<vmem>>) attributes {dimension_semantics = [#tpu.dimension_semantics<arbitrary>], iteration_bounds = array<i64: 1>, scalar_prefetch = 0 : i64, scratch_operands = 0 : i64, tpu.core_type = #tpu.core_type<tc>, window_params = [{transform_indices = @transform_0, window_bounds = array<i64: 8, 16>}, {transform_indices = @transform_1, window_bounds = array<i64: 8, 1>}, {pipeline_mode = #tpu.pipeline_mode<synchronous>, transform_indices = @transform_2, window_bounds = array<i64: 1, 1>}]} {
    %c0_i32 = arith.constant 0 : i32
    %0 = arith.cmpi eq, %arg0, %c0_i32 : i32
    %1 = arith.extui %0 : i1 to i32
    %c0_i32_0 = arith.constant 0 : i32
    %2 = arith.cmpi ne, %1, %c0_i32_0 : i32
    scf.if %2 {
      %cst_17 = arith.constant 0.000000e+00 : f32
      %45 = vector.broadcast %cst_17 : f32 to vector<1x1xf32>
      %c0_18 = arith.constant 0 : index
      %c0_19 = arith.constant 0 : index
      %46 = vector.load %arg3[%c0_18, %c0_19] : memref<1x1xf32, #tpu.memory_space<vmem>>, vector<1x1xf32>
      tpu.vector_store %arg3[%c0_18, %c0_19], %45 {strides = array<i32>} : memref<1x1xf32, #tpu.memory_space<vmem>>, vector<1x1xf32>,
    } else {
    }
    %c0 = arith.constant 0 : index
    %c0_1 = arith.constant 0 : index
    %3 = vector.load %arg1[%c0, %c0_1] : memref<8x16xf32, #tpu.memory_space<vmem>>, vector<8x16xf32>
    %c0_2 = arith.constant 0 : index
    %c0_3 = arith.constant 0 : index
    %4 = vector.load %arg2[%c0_2, %c0_3] : memref<8x1xi32, #tpu.memory_space<vmem>>, vector<8x1xi32>
    %cst = arith.constant dense<0xFF800000> : vector<8xf32>
    %5 = vector.multi_reduction <maximumf>, %3, %cst [1] : vector<8x16xf32> to vector<8xf32>
    %6 = vector.shape_cast %5 : vector<8xf32> to vector<8x1xf32>
    %7 = tpu.iota {dimensions = array<i32: 1>} : vector<1x16xi32>
    %8 = vector.broadcast %7 : vector<1x16xi32> to vector<8x16xi32>
    %9 = vector.broadcast %4 : vector<8x1xi32> to vector<8x16xi32>
    %10 = arith.cmpi eq, %8, %9 : vector<8x16xi32>
    %cst_4 = arith.constant 0.000000e+00 : f32
    %11 = vector.broadcast %cst_4 : f32 to vector<8x16xf32>
    %12 = arith.select %10, %3, %11 : vector<8x16xi1>, vector<8x16xf32>
    %cst_5 = arith.constant dense<0.000000e+00> : vector<8xf32>
    %13 = vector.multi_reduction <add>, %12, %cst_5 [1] : vector<8x16xf32> to vector<8xf32>
    %14 = vector.shape_cast %13 : vector<8xf32> to vector<8x1xf32>
    %15 = arith.subf %14, %6 : vector<8x1xf32>
    %16 = vector.broadcast %6 : vector<8x1xf32> to vector<8x16xf32>
    %17 = arith.subf %3, %16 : vector<8x16xf32>
    %18 = math.exp %17 : vector<8x16xf32>
    %cst_6 = arith.constant dense<0.000000e+00> : vector<8xf32>
    %19 = vector.multi_reduction <add>, %18, %cst_6 [1] : vector<8x16xf32> to vector<8xf32>
    %20 = vector.shape_cast %19 : vector<8xf32> to vector<8x1xf32>
    %21 = math.log %20 : vector<8x1xf32>
    %22 = arith.subf %21, %15 : vector<8x1xf32>
    %cst_7 = arith.constant 0.000000e+00 : f32
    %23 = vector.broadcast %cst_7 : f32 to vector<8x1xf32>
    %24 = arith.subf %23, %22 : vector<8x1xf32>
    %25 = math.exp %24 : vector<8x1xf32>
    %cst_8 = arith.constant 1.000000e+00 : f32
    %26 = vector.broadcast %cst_8 : f32 to vector<8x1xf32>
    %27 = arith.subf %26, %25 : vector<8x1xf32>
    %cst_9 = arith.constant 1.000000e+00 : f32
    %28 = vector.broadcast %cst_9 : f32 to vector<8x1xf32>
    %29 = arith.mulf %28, %27 : vector<8x1xf32>
    %30 = arith.mulf %29, %27 : vector<8x1xf32>
    %31 = arith.mulf %30, %22 : vector<8x1xf32>
    %32 = tpu.iota {dimensions = array<i32: 0>} : vector<8x1xi32>
    %c8_i32 = arith.constant 8 : i32
    %33 = arith.muli %arg0, %c8_i32 : i32
    %34 = vector.broadcast %33 : i32 to vector<8x1xi32>
    %35 = arith.addi %32, %34 : vector<8x1xi32>
    %c8_i32_10 = arith.constant 8 : i32
    %36 = vector.broadcast %c8_i32_10 : i32 to vector<8x1xi32>
    %37 = arith.cmpi slt, %35, %36 : vector<8x1xi32>
    %cst_11 = arith.constant 0.000000e+00 : f32
    %38 = vector.broadcast %cst_11 : f32 to vector<8x1xf32>
    %39 = arith.select %37, %31, %38 : vector<8x1xi1>, vector<8x1xf32>
    %c0_12 = arith.constant 0 : index
    %c0_13 = arith.constant 0 : index
    %40 = vector.load %arg3[%c0_12, %c0_13] : memref<1x1xf32, #tpu.memory_space<vmem>>, vector<1x1xf32>
    %cst_14 = arith.constant dense<0.000000e+00> : vector<1xf32>
    %41 = vector.multi_reduction <add>, %39, %cst_14 [0] : vector<8x1xf32> to vector<1xf32>
    %42 = vector.shape_cast %41 : vector<1xf32> to vector<1x1xf32>
    %43 = arith.addf %40, %42 : vector<1x1xf32>
    %c0_15 = arith.constant 0 : index
    %c0_16 = arith.constant 0 : index
    %44 = vector.load %arg3[%c0_15, %c0_16] : memref<1x1xf32, #tpu.memory_space<vmem>>, vector<1x1xf32>
    tpu.vector_store %arg3[%c0_15, %c0_16], %43 {strides = array<i32>} : memref<1x1xf32, #tpu.memory_space<vmem>>, vector<1x1xf32>,
    return
  }
  func.func @transform_0(%arg0: i32) -> (i32, i32) {
    %c0_i32 = arith.constant 0 : i32
    %c0_i32_0 = arith.constant 0 : i32
    return %arg0, %c0_i32 : i32, i32
  }
  func.func @transform_1(%arg0: i32) -> (i32, i32) {
    %c0_i32 = arith.constant 0 : i32
    %c0_i32_0 = arith.constant 0 : i32
    return %arg0, %c0_i32 : i32, i32
  }
  func.func @transform_2(%arg0: i32) -> (i32, i32) {
    %c0_i32 = arith.constant 0 : i32
    %c0_i32_0 = arith.constant 0 : i32
    %c0_i32_1 = arith.constant 0 : i32
    return %c0_i32, %c0_i32_0 : i32, i32
  }
}

</mosaic_0001>

<bundles_post_ra>
// kernel: tpu_custom_call.1
= control target key start
LH: loop header
LB: loop body
LE: loop exit
PB: predicated region body
PF: predicated region fallthrough
CT: control target
= control target key end

     0   :  { %vm20_vm0 = vcmask 130048   ;;  %s151_s0 = inlined_call_operand.vmem [shape: f32[8,16], index: 0, kind: input, shape index: {}]   ;;  %s152_s1 = inlined_call_operand.vmem [shape: s32[8,1], index: 1, kind: input, shape index: {}]   ;;  %s153_s2 = inlined_call_operand.hbm [shape: f32[1,1], index: 2, kind: output, shape index: {}]  }
   0x1   :  { %v18_v0 = vld [vmem:[%s151_s0] sm:$0xff] }
   0x2   :  { %7 = vsyncpa [#allocation3], 0  ;;  %v21_v1 = vsel %vm20_vm0, %v18_v0, -inf  ;;  %v119_v2 = vmov 0   ;;  %v19_v3 = vld [vmem:[%s152_s1] sm:$0xff]  ;;  %v24_v9 = vlaneseq  ;;  %vm16_vm2 = vcmask 0  }
   0x3   :  { %86 = vset.pattern.permute.xlu0 %v119_v2  ;;  %v120_v15 = vmov 0.0   ;;  %s121_s0 = smov [#allocation2]   ;;  %s74_s15 = sshll.u32 %s153_s2, 4  ;;  %s75_s15 = int_to_ptr.hbm [resolvable:$true] %s74_s15 }
   0x4   :  { %22 = vmax.xlane.f32.xlu0 %v21_v1  ;;  %v25_v10 = vand.u32 127, %v24_v9  ;;  %17 = vst.msk [vmem:[#allocation2] sm:$0x1] %vm16_vm2, %v120_v15  ;;  %s72_s1 = sshll.u32 %s121_s0, 4  ;;  %s73_s1 = int_to_ptr.vmem [resolvable:$true] %s72_s1 }
   0xb   :  { %v57_v32 = vld [vmem:[#allocation2] sm:$0x1] }
  0x18   :  { %27 = vperm.xlu0 %86, %v19_v3  }
  0x77   :  { %v23_v4 = vpop.xlane.xlu0 %22 }
  0x78   :  { %v35_v5 = vsub.f32 %v18_v0, %v23_v4 }
  0x7a   :  { %v36_v6 = vmul.f32 1.442695, %v35_v5 }
  0x7c   :  { %87 = vpow2.f32 %v36_v6 }
  0x82   :  { %v88_v7 = vpop.eup %87 }
  0x83   :  { %v38_v8 = vsel %vm20_vm0, %v88_v7, 0.0 }
  0x84   :  { %39 = vadd.xlane.f32.xlu1 %v38_v8 }
  0x8a   :  { %v28_v11 = vpop.permute.xlu0 %27 }
  0x8b   :  { %vm29_vm1 = vcmp.eq.s32.totalorder %v25_v10, %v28_v11 }
  0x8c   :  { %v30_v12 = vsel %vm29_vm1, %v18_v0, 0.0 }
  0x8d   :  { %v31_v13 = vsel %vm20_vm0, %v30_v12, 0.0 }
  0x8e   :  { %32 = vadd.xlane.f32.xlu1 %v31_v13 }
  0xf7   :  { %v40_v14 = vpop.xlane.xlu1 %39 }
  0xf8   :  { %89 = vlog2.f32 %v40_v14 }
  0xfe   :  { %v90_v16 = vpop.eup %89 }
  0xff   :  { %v42_v18 = vmul.f32 0.6931472, %v90_v16 }
 0x101   :  { %v33_v17 = vpop.xlane.xlu1 %32 }
 0x102   :  { %v34_v19 = vsub.f32 %v33_v17, %v23_v4 }
 0x104   :  { %v43_v20 = vsub.f32 %v42_v18, %v34_v19 }
 0x106   :  { %v44_v21 = vsub.f32 0.0, %v43_v20 }
 0x108   :  { %v45_v22 = vmul.f32 1.442695, %v44_v21 }
 0x10a   :  { %91 = vpow2.f32 %v45_v22 }
 0x110   :  { %v92_v23 = vpop.eup %91 }
 0x111   :  { %v47_v24 = vsub.f32 1.0, %v92_v23 }
 0x113   :  { %v48_v25 = vmul.f32 %v47_v24, %v47_v24 }
 0x115   :  { %v49_v26 = vmul.f32 %v48_v25, %v43_v20 }
 0x117   :  { %v58_v27 = vrot.slane %v49_v26, 4 }
 0x119   :  { %v59_v28 = vadd.f32 %v58_v27, %v49_v26 }
 0x11b   :  { %v60_v29 = vrot.slane %v59_v28, 2 }
 0x11d   :  { %v61_v30 = vadd.f32 %v60_v29, %v59_v28 }
 0x11f   :  { %v62_v31 = vrot.slane %v61_v30, 1 }
 0x121   :  { %v63_v33 = vadd.f32 %v62_v31, %v61_v30 }
 0x123   :  { %v64_v34 = vadd.f32 %v63_v33, %v57_v32 }
 0x125   :  { %66 = vst.msk [vmem:[#allocation2] sm:$0x1] %vm16_vm2, %v64_v34 }
 0x126   :  { %77 = dma.vmem_to_hbm [thread:$0]  %s73_s1, 16, %s75_s15, [#allocation3]  }
 0x127   :  { %117 = dma.done.wait [#allocation3], 16  }
 0x128   :  { %118 = vsyncadd [#allocation3], 4294967280 }
 0x129   :  { %82 = vsyncpa [#allocation3], 1 }

</bundles_post_ra>
